<compile_context>
chip_gen: v5e
topology: v5e:2x2
jax: 0.10.0
libtpu: 0.0.40
codegen_flags: <defaults>
</compile_context>

<pallas_src>
import functools

import jax
import jax.numpy as jnp
from jax.experimental import pallas as pl
from jax.experimental.pallas import tpu as pltpu

_LANE = 128      # vreg lane width  (last-dim alignment)
_SUBLANE = 8     # vreg sublane count (second-to-last-dim alignment)


def _round_up(x, m):
    return ((x + m - 1) // m) * m


def mlp_kernel(x_ref, w1_ref, b1_ref, w2_ref, b2_ref, w3_ref, b3_ref,
               wo_ref, bo_ref, o_ref):
    """Fused 3-hidden-layer MLP + output projection on one batch tile."""
    x = x_ref[...]
    # hidden layer 1 + ReLU (the extra nn.ReLU() in the Sequential is idempotent)
    h = jnp.dot(x, w1_ref[...], preferred_element_type=jnp.float32) + b1_ref[...]
    h = jnp.maximum(h, 0.0)
    # hidden layer 2 + ReLU
    h = jnp.dot(h.astype(w2_ref.dtype), w2_ref[...],
                preferred_element_type=jnp.float32) + b2_ref[...]
    h = jnp.maximum(h, 0.0)
    # hidden layer 3 + ReLU
    h = jnp.dot(h.astype(w3_ref.dtype), w3_ref[...],
                preferred_element_type=jnp.float32) + b3_ref[...]
    h = jnp.maximum(h, 0.0)
    # output layer (no activation)
    o_ref[...] = (jnp.dot(h.astype(wo_ref.dtype), wo_ref[...],
                          preferred_element_type=jnp.float32)
                  + bo_ref[...]).astype(o_ref.dtype)


@functools.partial(jax.jit, static_argnames=("batch_tile", "use_bf16"))
def mlp_forward(x, params, *, batch_tile=256, use_bf16=False):
    """x: (B, in_features) float32.  params: dict of (in,out) weights / (1,out) biases."""
    B, in_f = x.shape
    hid = params["w1"].shape[1]
    out_f = params["wo"].shape[1]

    # Lane-dense padded feature dims (multiples of 128).
    in_p = _round_up(in_f, _LANE)
    hid_p = _round_up(hid, _LANE)
    out_p = _round_up(out_f, _LANE)

    # Batch tile: MXU-aligned when B is large, clamped (multiple of 8) when B is small.
    bt = min(batch_tile, _round_up(B, _SUBLANE))
    bt = max(_SUBLANE, _round_up(bt, _SUBLANE))
    B_p = _round_up(B, bt)
    grid = (B_p // bt,)

    w_dtype = jnp.bfloat16 if use_bf16 else jnp.float32

    def pad2(a, rows, cols, dtype):
        a = jnp.pad(a, ((0, rows - a.shape[0]), (0, cols - a.shape[1])))
        return a.astype(dtype)

    xp = pad2(x, B_p, in_p, w_dtype)
    w1 = pad2(params["w1"], in_p, hid_p, w_dtype)
    w2 = pad2(params["w2"], hid_p, hid_p, w_dtype)
    w3 = pad2(params["w3"], hid_p, hid_p, w_dtype)
    wo = pad2(params["wo"], hid_p, out_p, w_dtype)
    b1 = pad2(params["b1"], 1, hid_p, jnp.float32)
    b2 = pad2(params["b2"], 1, hid_p, jnp.float32)
    b3 = pad2(params["b3"], 1, hid_p, jnp.float32)
    bo = pad2(params["bo"], 1, out_p, jnp.float32)

    rows = lambda i: (i, 0)          # x / out: tile over batch
    full = lambda i: (0, 0)          # weights / biases: same full block every step

    out_padded = pl.pallas_call(
        mlp_kernel,
        out_shape=jax.ShapeDtypeStruct((B_p, out_p), jnp.float32),
        grid=grid,
        in_specs=[
            pl.BlockSpec((bt, in_p), rows),       # x
            pl.BlockSpec((in_p, hid_p), full),    # w1
            pl.BlockSpec((1, hid_p), full),       # b1
            pl.BlockSpec((hid_p, hid_p), full),   # w2
            pl.BlockSpec((1, hid_p), full),       # b2
            pl.BlockSpec((hid_p, hid_p), full),   # w3
            pl.BlockSpec((1, hid_p), full),       # b3
            pl.BlockSpec((hid_p, out_p), full),   # wo
            pl.BlockSpec((1, out_p), full),       # bo
        ],
        out_specs=pl.BlockSpec((bt, out_p), rows),
        compiler_params=pltpu.CompilerParams(
            dimension_semantics=("parallel",),
            vmem_limit_bytes=32 * 1024 * 1024,
        ),
    )(xp, w1, b1, w2, b2, w3, b3, wo, bo)

    # Drop batch / feature padding.
    return out_padded[:B, :out_f]


def init_params(key, in_features, out_features):
    """Deterministic synthetic parameters (shapes follow MLP.__init__)."""
    hid = 2 * in_features
    ks = jax.random.split(key, 8)
    scale = 0.1
    return {
        "w1": scale * jax.random.normal(ks[0], (in_features, hid), jnp.float32),
        "b1": scale * jax.random.normal(ks[1], (1, hid), jnp.float32),
        "w2": scale * jax.random.normal(ks[2], (hid, hid), jnp.float32),
        "b2": scale * jax.random.normal(ks[3], (1, hid), jnp.float32),
        "w3": scale * jax.random.normal(ks[4], (hid, hid), jnp.float32),
        "b3": scale * jax.random.normal(ks[5], (1, hid), jnp.float32),
        "wo": scale * jax.random.normal(ks[6], (hid, out_features), jnp.float32),
        "bo": scale * jax.random.normal(ks[7], (1, out_features), jnp.float32),
    }


def mlp_reference(x, p):
    """Plain-JAX reference mirroring the PyTorch forward."""
    h = jnp.maximum(x @ p["w1"] + p["b1"], 0.0)
    h = jnp.maximum(h, 0.0)                        # the extra nn.ReLU()
    h = jnp.maximum(h @ p["w2"] + p["b2"], 0.0)
    h = jnp.maximum(h @ p["w3"] + p["b3"], 0.0)
    return h @ p["wo"] + p["bo"]


if __name__ == "__main__":
    in_features, out_features = 32, 8
    batch = 16

    key = jax.random.PRNGKey(0)
    kx, kp = jax.random.split(key)
    x = jax.random.normal(kx, (batch, in_features), jnp.float32)
    params = init_params(kp, in_features, out_features)
    ref = mlp_reference(x, params)

    # f32 path — exact (up to f32 rounding) vs reference.
    out = jax.block_until_ready(mlp_forward(x, params))
    assert out.shape == (batch, out_features)
    assert jnp.allclose(out, ref, atol=1e-5, rtol=1e-5), "f32 mismatch vs reference"

    # bf16-weight path (v6e/v7x MXU lever) — f32 accumulation, loose tolerance.
    out_bf16 = jax.block_until_ready(mlp_forward(x, params, use_bf16=True))
    assert out_bf16.shape == (batch, out_features)
    assert jnp.allclose(out_bf16, ref, atol=5e-2, rtol=5e-2), "bf16 mismatch vs reference"

    print("KERNEL_OK")
</pallas_src>

<mosaic_0001>
module attributes {stable_mosaic.version = 11 : i64} {
  func.func @mlp_kernel(%arg0: i32, %arg1: memref<16x128xf32, #tpu.memory_space<vmem>>, %arg2: memref<128x128xf32, #tpu.memory_space<vmem>>, %arg3: memref<1x128xf32, #tpu.memory_space<vmem>>, %arg4: memref<128x128xf32, #tpu.memory_space<vmem>>, %arg5: memref<1x128xf32, #tpu.memory_space<vmem>>, %arg6: memref<128x128xf32, #tpu.memory_space<vmem>>, %arg7: memref<1x128xf32, #tpu.memory_space<vmem>>, %arg8: memref<128x128xf32, #tpu.memory_space<vmem>>, %arg9: memref<1x128xf32, #tpu.memory_space<vmem>>, %arg10: memref<16x128xf32, #tpu.memory_space<vmem>>) attributes {dimension_semantics = [#tpu.dimension_semantics<parallel>], iteration_bounds = array<i64: 1>, scalar_prefetch = 0 : i64, scratch_operands = 0 : i64, tpu.core_type = #tpu.core_type<tc>, window_params = [{transform_indices = @transform_0, window_bounds = array<i64: 16, 128>}, {pipeline_mode = #tpu.pipeline_mode<synchronous>, transform_indices = @transform_1, window_bounds = array<i64: 128, 128>}, {pipeline_mode = #tpu.pipeline_mode<synchronous>, transform_indices = @transform_2, window_bounds = array<i64: 1, 128>}, {pipeline_mode = #tpu.pipeline_mode<synchronous>, transform_indices = @transform_3, window_bounds = array<i64: 128, 128>}, {pipeline_mode = #tpu.pipeline_mode<synchronous>, transform_indices = @transform_4, window_bounds = array<i64: 1, 128>}, {pipeline_mode = #tpu.pipeline_mode<synchronous>, transform_indices = @transform_5, window_bounds = array<i64: 128, 128>}, {pipeline_mode = #tpu.pipeline_mode<synchronous>, transform_indices = @transform_6, window_bounds = array<i64: 1, 128>}, {pipeline_mode = #tpu.pipeline_mode<synchronous>, transform_indices = @transform_7, window_bounds = array<i64: 128, 128>}, {pipeline_mode = #tpu.pipeline_mode<synchronous>, transform_indices = @transform_8, window_bounds = array<i64: 1, 128>}, {transform_indices = @transform_9, window_bounds = array<i64: 16, 128>}]} {
    %c0 = arith.constant 0 : index
    %c0_0 = arith.constant 0 : index
    %0 = vector.load %arg1[%c0, %c0_0] : memref<16x128xf32, #tpu.memory_space<vmem>>, vector<16x128xf32>
    %c0_1 = arith.constant 0 : index
    %c0_2 = arith.constant 0 : index
    %1 = vector.load %arg2[%c0_1, %c0_2] : memref<128x128xf32, #tpu.memory_space<vmem>>, vector<128x128xf32>
    %cst = arith.constant dense<0.000000e+00> : vector<16x128xf32>
    %2 = tpu.matmul %0, %1, %cst {dimension_numbers = #tpu.dot_dimension_numbers<[1], [0], [0], [1], [0, 0, 1, 1], [], []>} : vector<16x128xf32>, vector<128x128xf32>, vector<16x128xf32> -> vector<16x128xf32>
    %c0_3 = arith.constant 0 : index
    %c0_4 = arith.constant 0 : index
    %3 = vector.load %arg3[%c0_3, %c0_4] : memref<1x128xf32, #tpu.memory_space<vmem>>, vector<1x128xf32>
    %4 = vector.broadcast %3 : vector<1x128xf32> to vector<16x128xf32>
    %5 = arith.addf %2, %4 : vector<16x128xf32>
    %cst_5 = arith.constant 0.000000e+00 : f32
    %6 = vector.broadcast %cst_5 : f32 to vector<16x128xf32>
    %7 = arith.maximumf %5, %6 : vector<16x128xf32>
    %c0_6 = arith.constant 0 : index
    %c0_7 = arith.constant 0 : index
    %8 = vector.load %arg4[%c0_6, %c0_7] : memref<128x128xf32, #tpu.memory_space<vmem>>, vector<128x128xf32>
    %cst_8 = arith.constant dense<0.000000e+00> : vector<16x128xf32>
    %9 = tpu.matmul %7, %8, %cst_8 {dimension_numbers = #tpu.dot_dimension_numbers<[1], [0], [0], [1], [0, 0, 1, 1], [], []>} : vector<16x128xf32>, vector<128x128xf32>, vector<16x128xf32> -> vector<16x128xf32>
    %c0_9 = arith.constant 0 : index
    %c0_10 = arith.constant 0 : index
    %10 = vector.load %arg5[%c0_9, %c0_10] : memref<1x128xf32, #tpu.memory_space<vmem>>, vector<1x128xf32>
    %11 = vector.broadcast %10 : vector<1x128xf32> to vector<16x128xf32>
    %12 = arith.addf %9, %11 : vector<16x128xf32>
    %cst_11 = arith.constant 0.000000e+00 : f32
    %13 = vector.broadcast %cst_11 : f32 to vector<16x128xf32>
    %14 = arith.maximumf %12, %13 : vector<16x128xf32>
    %c0_12 = arith.constant 0 : index
    %c0_13 = arith.constant 0 : index
    %15 = vector.load %arg6[%c0_12, %c0_13] : memref<128x128xf32, #tpu.memory_space<vmem>>, vector<128x128xf32>
    %cst_14 = arith.constant dense<0.000000e+00> : vector<16x128xf32>
    %16 = tpu.matmul %14, %15, %cst_14 {dimension_numbers = #tpu.dot_dimension_numbers<[1], [0], [0], [1], [0, 0, 1, 1], [], []>} : vector<16x128xf32>, vector<128x128xf32>, vector<16x128xf32> -> vector<16x128xf32>
    %c0_15 = arith.constant 0 : index
    %c0_16 = arith.constant 0 : index
    %17 = vector.load %arg7[%c0_15, %c0_16] : memref<1x128xf32, #tpu.memory_space<vmem>>, vector<1x128xf32>
    %18 = vector.broadcast %17 : vector<1x128xf32> to vector<16x128xf32>
    %19 = arith.addf %16, %18 : vector<16x128xf32>
    %cst_17 = arith.constant 0.000000e+00 : f32
    %20 = vector.broadcast %cst_17 : f32 to vector<16x128xf32>
    %21 = arith.maximumf %19, %20 : vector<16x128xf32>
    %c0_18 = arith.constant 0 : index
    %c0_19 = arith.constant 0 : index
    %22 = vector.load %arg8[%c0_18, %c0_19] : memref<128x128xf32, #tpu.memory_space<vmem>>, vector<128x128xf32>
    %cst_20 = arith.constant dense<0.000000e+00> : vector<16x128xf32>
    %23 = tpu.matmul %21, %22, %cst_20 {dimension_numbers = #tpu.dot_dimension_numbers<[1], [0], [0], [1], [0, 0, 1, 1], [], []>} : vector<16x128xf32>, vector<128x128xf32>, vector<16x128xf32> -> vector<16x128xf32>
    %c0_21 = arith.constant 0 : index
    %c0_22 = arith.constant 0 : index
    %24 = vector.load %arg9[%c0_21, %c0_22] : memref<1x128xf32, #tpu.memory_space<vmem>>, vector<1x128xf32>
    %25 = vector.broadcast %24 : vector<1x128xf32> to vector<16x128xf32>
    %26 = arith.addf %23, %25 : vector<16x128xf32>
    %c0_23 = arith.constant 0 : index
    %c0_24 = arith.constant 0 : index
    %27 = vector.load %arg10[%c0_23, %c0_24] : memref<16x128xf32, #tpu.memory_space<vmem>>, vector<16x128xf32>
    tpu.vector_store %arg10[%c0_23, %c0_24], %26 {strides = array<i32>} : memref<16x128xf32, #tpu.memory_space<vmem>>, vector<16x128xf32>,
    return
  }
  func.func @transform_0(%arg0: i32) -> (i32, i32) {
    %c0_i32 = arith.constant 0 : i32
    %c0_i32_0 = arith.constant 0 : i32
    return %arg0, %c0_i32 : i32, i32
  }
  func.func @transform_1(%arg0: i32) -> (i32, i32) {
    %c0_i32 = arith.constant 0 : i32
    %c0_i32_0 = arith.constant 0 : i32
    %c0_i32_1 = arith.constant 0 : i32
    return %c0_i32, %c0_i32_0 : i32, i32
  }
  func.func @transform_2(%arg0: i32) -> (i32, i32) {
    %c0_i32 = arith.constant 0 : i32
    %c0_i32_0 = arith.constant 0 : i32
    %c0_i32_1 = arith.constant 0 : i32
    return %c0_i32, %c0_i32_0 : i32, i32
  }
  func.func @transform_3(%arg0: i32) -> (i32, i32) {
    %c0_i32 = arith.constant 0 : i32
    %c0_i32_0 = arith.constant 0 : i32
    %c0_i32_1 = arith.constant 0 : i32
    return %c0_i32, %c0_i32_0 : i32, i32
  }
  func.func @transform_4(%arg0: i32) -> (i32, i32) {
    %c0_i32 = arith.constant 0 : i32
    %c0_i32_0 = arith.constant 0 : i32
    %c0_i32_1 = arith.constant 0 : i32
    return %c0_i32, %c0_i32_0 : i32, i32
  }
  func.func @transform_5(%arg0: i32) -> (i32, i32) {
    %c0_i32 = arith.constant 0 : i32
    %c0_i32_0 = arith.constant 0 : i32
    %c0_i32_1 = arith.constant 0 : i32
    return %c0_i32, %c0_i32_0 : i32, i32
  }
  func.func @transform_6(%arg0: i32) -> (i32, i32) {
    %c0_i32 = arith.constant 0 : i32
    %c0_i32_0 = arith.constant 0 : i32
    %c0_i32_1 = arith.constant 0 : i32
    return %c0_i32, %c0_i32_0 : i32, i32
  }
  func.func @transform_7(%arg0: i32) -> (i32, i32) {
    %c0_i32 = arith.constant 0 : i32
    %c0_i32_0 = arith.constant 0 : i32
    %c0_i32_1 = arith.constant 0 : i32
    return %c0_i32, %c0_i32_0 : i32, i32
  }
  func.func @transform_8(%arg0: i32) -> (i32, i32) {
    %c0_i32 = arith.constant 0 : i32
    %c0_i32_0 = arith.constant 0 : i32
    %c0_i32_1 = arith.constant 0 : i32
    return %c0_i32, %c0_i32_0 : i32, i32
  }
  func.func @transform_9(%arg0: i32) -> (i32, i32) {
    %c0_i32 = arith.constant 0 : i32
    %c0_i32_0 = arith.constant 0 : i32
    return %arg0, %c0_i32 : i32, i32
  }
}

</mosaic_0001>

<bundles_post_ra>
// kernel: mlp_forward.1
= control target key start
LH: loop header
LB: loop body
LE: loop exit
PB: predicated region body
PF: predicated region fallthrough
CT: control target
= control target key end

     0   :  { %s488_s1 = inlined_call_operand.vmem [shape: f32[128,128], index: 1, kind: input, shape index: {}]   ;;  %s489_s3 = inlined_call_operand.vmem [shape: f32[128,128], index: 3, kind: input, shape index: {}]   ;;  %s490_s2 = inlined_call_operand.vmem [shape: f32[1,128], index: 2, kind: input, shape index: {}]   ;;  %s491_s0 = inlined_call_operand.vmem [shape: f32[16,128], index: 0, kind: input, shape index: {}]   ;;  %s492_s4 = inlined_call_operand.vmem [shape: f32[1,128], index: 4, kind: input, shape index: {}]   ;;  %s493_s5 = inlined_call_operand.vmem [shape: f32[128,128], index: 5, kind: input, shape index: {}]   ;;  %s494_s6 = inlined_call_operand.vmem [shape: f32[1,128], index: 6, kind: input, shape index: {}]   ;;  %s495_s7 = inlined_call_operand.vmem [shape: f32[128,128], index: 7, kind: input, shape index: {}]   ;;  %s496_s8 = inlined_call_operand.vmem [shape: f32[1,128], index: 8, kind: input, shape index: {}]   ;;  %s497_s9 = inlined_call_operand.vmem [shape: f32[16,128], index: 9, kind: output, shape index: {}]  }
   0x1   :  { %v49_v0 = vld [vmem:[%s488_s1 + $0x78] sm:$0xff]  ;;  %v48_v1 = vld [vmem:[%s488_s1 + $0x70] sm:$0xff]  ;;  %v47_v2 = vld [vmem:[%s488_s1 + $0x68] sm:$0xff] }
   0x2   :  { %54 = vmatpush.msra.mxu0 %v49_v0  ;;  %v46_v3 = vld [vmem:[%s488_s1 + $0x60] sm:$0xff]  ;;  %v45_v4 = vld [vmem:[%s488_s1 + $0x58] sm:$0xff]  ;;  %v44_v5 = vld [vmem:[%s488_s1 + $0x50] sm:$0xff] }
   0x3   :  { %v94_v6 = vld [vmem:[%s489_s3 + $0x78] sm:$0xff]  ;;  %v93_v7 = vld [vmem:[%s489_s3 + $0x70] sm:$0xff]  ;;  %v43_v8 = vld [vmem:[%s488_s1 + $0x48] sm:$0xff] }
   0x4   :  { %55 = vmatpush.msra.mxu0 %v48_v1  ;;  %99 = vmatpush.msra.mxu1 %v94_v6  ;;  %v92_v9 = vld [vmem:[%s489_s3 + $0x68] sm:$0xff]  ;;  %v42_v10 = vld [vmem:[%s488_s1 + $0x40] sm:$0xff]  ;;  %v41_v12 = vld [vmem:[%s488_s1 + $0x38] sm:$0xff] }
   0x5   :  { %v91_v11 = vld [vmem:[%s489_s3 + $0x60] sm:$0xff]  ;;  %v90_v13 = vld [vmem:[%s489_s3 + $0x58] sm:$0xff]  ;;  %v40_v14 = vld [vmem:[%s488_s1 + $0x30] sm:$0xff] }
   0x6   :  { %56 = vmatpush.msra.mxu0 %v47_v2  ;;  %100 = vmatpush.msra.mxu1 %v93_v7  ;;  %v89_v15 = vld [vmem:[%s489_s3 + $0x50] sm:$0xff]  ;;  %v39_v16 = vld [vmem:[%s488_s1 + $0x28] sm:$0xff]  ;;  %v38_v18 = vld [vmem:[%s488_s1 + $0x20] sm:$0xff] }
   0x7   :  { %v88_v17 = vld [vmem:[%s489_s3 + $0x48] sm:$0xff]  ;;  %v87_v19 = vld [vmem:[%s489_s3 + $0x40] sm:$0xff]  ;;  %v37_v20 = vld [vmem:[%s488_s1 + $0x18] sm:$0xff] }
   0x8   :  { %57 = vmatpush.msra.mxu0 %v46_v3  ;;  %101 = vmatpush.msra.mxu1 %v92_v9  ;;  %v86_v21 = vld [vmem:[%s489_s3 + $0x38] sm:$0xff]  ;;  %v36_v22 = vld [vmem:[%s488_s1 + $0x10] sm:$0xff]  ;;  %v35_v24 = vld [vmem:[%s488_s1 + $0x8] sm:$0xff] }
   0x9   :  { %v85_v23 = vld [vmem:[%s489_s3 + $0x30] sm:$0xff]  ;;  %v84_v25 = vld [vmem:[%s489_s3 + $0x28] sm:$0xff]  ;;  %v34_v26 = vld [vmem:[%s488_s1] sm:$0xff] }
   0xa   :  { %58 = vmatpush.msra.mxu0 %v45_v4  ;;  %102 = vmatpush.msra.mxu1 %v91_v11  ;;  %v83_v27 = vld [vmem:[%s489_s3 + $0x20] sm:$0xff]  ;;  %v82_v29 = vld [vmem:[%s489_s3 + $0x18] sm:$0xff]  ;;  %v33_v30 = vld [vmem:[%s491_s0 + $0x8] sm:$0xff] }
   0xb   :  { %v32_v28 = vld [vmem:[%s491_s0] sm:$0xff]  ;;  %v81_v31 = vld [vmem:[%s489_s3 + $0x10] sm:$0xff]  ;;  %v80_v32 = vld [vmem:[%s489_s3 + $0x8] sm:$0xff] }
   0xc   :  { %59 = vmatpush.msra.mxu0 %v44_v5  ;;  %103 = vmatpush.msra.mxu1 %v90_v13  ;;  %v79_v33 = vld [vmem:[%s489_s3] sm:$0xff]  ;;  %v139_v34 = vld [vmem:[%s493_s5 + $0x78] sm:$0xff]  ;;  %v138_v35 = vld [vmem:[%s493_s5 + $0x70] sm:$0xff] }
   0xd   :  { %144 = vmatpush.msra.mxu2 %v139_v34  ;;  %v137_v36 = vld [vmem:[%s493_s5 + $0x68] sm:$0xff]  ;;  %v136_v37 = vld [vmem:[%s493_s5 + $0x60] sm:$0xff]  ;;  %v135_v38 = vld [vmem:[%s493_s5 + $0x58] sm:$0xff] }
   0xe   :  { %60 = vmatpush.msra.mxu0 %v43_v8  ;;  %104 = vmatpush.msra.mxu1 %v89_v15  ;;  %v134_v39 = vld [vmem:[%s493_s5 + $0x50] sm:$0xff]  ;;  %v133_v40 = vld [vmem:[%s493_s5 + $0x48] sm:$0xff]  ;;  %v132_v41 = vld [vmem:[%s493_s5 + $0x40] sm:$0xff] }
   0xf   :  { %145 = vmatpush.msra.mxu2 %v138_v35  ;;  %v131_v42 = vld [vmem:[%s493_s5 + $0x38] sm:$0xff]  ;;  %v218_v43 = vld [vmem:[%s490_s2] ss:$0 sm:$0xff]  ;;  %v130_v44 = vld [vmem:[%s493_s5 + $0x30] sm:$0xff] }
  0x10   :  { %61 = vmatpush.msra.mxu0 %v42_v10  ;;  %105 = vmatpush.msra.mxu1 %v88_v17  ;;  %v129_v45 = vld [vmem:[%s493_s5 + $0x28] sm:$0xff]  ;;  %v128_v48 = vld [vmem:[%s493_s5 + $0x20] sm:$0xff]  ;;  %v127_v50 = vld [vmem:[%s493_s5 + $0x18] sm:$0xff] }
  0x11   :  { %146 = vmatpush.msra.mxu2 %v137_v36  ;;  %v126_v54 = vld [vmem:[%s493_s5 + $0x10] sm:$0xff]  ;;  %v125_v55 = vld [vmem:[%s493_s5 + $0x8] sm:$0xff]  ;;  %v124_v56 = vld [vmem:[%s493_s5] sm:$0xff] }
  0x12   :  { %62 = vmatpush.msra.mxu0 %v41_v12  ;;  %106 = vmatpush.msra.mxu1 %v87_v19  ;;  %v184_v57 = vld [vmem:[%s495_s7 + $0x78] sm:$0xff]  ;;  %v183_v58 = vld [vmem:[%s495_s7 + $0x70] sm:$0xff]  ;;  %v182_v59 = vld [vmem:[%s495_s7 + $0x68] sm:$0xff] }
  0x13   :  { %147 = vmatpush.msra.mxu2 %v136_v37  ;;  %189 = vmatpush.msra.mxu3 %v184_v57  ;;  %v181_v60 = vld [vmem:[%s495_s7 + $0x60] sm:$0xff]  ;;  %v180_v61 = vld [vmem:[%s495_s7 + $0x58] sm:$0xff]  ;;  %v179_v62 = vld [vmem:[%s495_s7 + $0x50] sm:$0xff] }
  0x14   :  { %63 = vmatpush.msra.mxu0 %v40_v14  ;;  %107 = vmatpush.msra.mxu1 %v86_v21  ;;  %v178_v63 = vld [vmem:[%s495_s7 + $0x48] sm:$0xff]  ;;  %v177_v0 = vld [vmem:[%s495_s7 + $0x40] sm:$0xff]  ;;  %v176_v1 = vld [vmem:[%s495_s7 + $0x38] sm:$0xff] }
  0x15   :  { %148 = vmatpush.msra.mxu2 %v135_v38  ;;  %190 = vmatpush.msra.mxu3 %v183_v58  ;;  %v219_v2 = vld [vmem:[%s492_s4] ss:$0 sm:$0xff]  ;;  %v175_v3 = vld [vmem:[%s495_s7 + $0x30] sm:$0xff]  ;;  %v174_v4 = vld [vmem:[%s495_s7 + $0x28] sm:$0xff] }
  0x16   :  { %64 = vmatpush.msra.mxu0 %v39_v16  ;;  %108 = vmatpush.msra.mxu1 %v85_v23  ;;  %v173_v7 = vld [vmem:[%s495_s7 + $0x20] sm:$0xff]  ;;  %v172_v9 = vld [vmem:[%s495_s7 + $0x18] sm:$0xff]  ;;  %v171_v13 = vld [vmem:[%s495_s7 + $0x10] sm:$0xff] }
  0x17   :  { %149 = vmatpush.msra.mxu2 %v134_v39  ;;  %191 = vmatpush.msra.mxu3 %v182_v59  ;;  %v170_v14 = vld [vmem:[%s495_s7 + $0x8] sm:$0xff]  ;;  %v169_v15 = vld [vmem:[%s495_s7] sm:$0xff] }
  0x18   :  { %65 = vmatpush.msra.mxu0 %v38_v18  ;;  %109 = vmatpush.msra.mxu1 %v84_v25  ;;  %v220_v16 = vld [vmem:[%s494_s6] ss:$0 sm:$0xff] }
  0x19   :  { %150 = vmatpush.msra.mxu2 %v133_v40  ;;  %192 = vmatpush.msra.mxu3 %v181_v60  ;;  %v221_v23 = vld [vmem:[%s496_s8] ss:$0 sm:$0xff] }
  0x1a   :  { %66 = vmatpush.msra.mxu0 %v37_v20  ;;  %110 = vmatpush.msra.mxu1 %v83_v27 }
  0x1b   :  { %151 = vmatpush.msra.mxu2 %v132_v41  ;;  %193 = vmatpush.msra.mxu3 %v180_v61 }
  0x1c   :  { %67 = vmatpush.msra.mxu0 %v36_v22  ;;  %111 = vmatpush.msra.mxu1 %v82_v29 }
  0x1d   :  { %152 = vmatpush.msra.mxu2 %v131_v42  ;;  %194 = vmatpush.msra.mxu3 %v179_v62 }
  0x1e   :  { %68 = vmatpush.msra.mxu0 %v35_v24  ;;  %112 = vmatpush.msra.mxu1 %v81_v31 }
  0x1f   :  { %153 = vmatpush.msra.mxu2 %v130_v44  ;;  %195 = vmatpush.msra.mxu3 %v178_v63 }
  0x20   :  { %69 = vmatpush.msra.mxu0 %v34_v26  ;;  %113 = vmatpush.msra.mxu1 %v80_v32 }
  0x21   :  { %70 = vmatmul.f32.vlgmr.msra.gmra.mxu0 %v32_v28  ;;  %154 = vmatpush.msra.mxu2 %v129_v45 }
  0x22   :  { %114 = vmatpush.msra.mxu1 %v79_v33  ;;  %196 = vmatpush.msra.mxu3 %v177_v0 }
  0x23   :  { %155 = vmatpush.msra.mxu2 %v128_v48 }
  0x24   :  { %197 = vmatpush.msra.mxu3 %v176_v1 }
  0x25   :  { %156 = vmatpush.msra.mxu2 %v127_v50 }
  0x26   :  { %198 = vmatpush.msra.mxu3 %v175_v3 }
  0x27   :  { %157 = vmatpush.msra.mxu2 %v126_v54 }
  0x28   :  { %199 = vmatpush.msra.mxu3 %v174_v4 }
  0x29   :  { %73 = vmatmul.f32.gmra.mxu0 %v33_v30  ;;  %158 = vmatpush.msra.mxu2 %v125_v55 }
  0x2a   :  { %200 = vmatpush.msra.mxu3 %v173_v7 }
  0x2b   :  { %159 = vmatpush.msra.mxu2 %v124_v56 }
  0x2c   :  { %201 = vmatpush.msra.mxu3 %v172_v9 }
  0x2e   :  { %202 = vmatpush.msra.mxu3 %v171_v13 }
  0x30   :  { %203 = vmatpush.msra.mxu3 %v170_v14 }
  0x32   :  { %204 = vmatpush.msra.mxu3 %v169_v15 }
  0x9e   :  { %v71_v46 = vpop.f32.mrf.mxu0 }
  0x9f   :  { %v72_v47 = vadd.f32 %v218_v43, %v71_v46 }
  0xa1   :  { %v77_v49 = vmax.f32 %v72_v47, 0.0 }
  0xa3   :  { %115 = vmatmul.f32.vlgmr.msra.gmra.mxu1 %v77_v49 }
  0xa6   :  { %v74_v51 = vpop.f32.mrf.mxu0 }
  0xa7   :  { %v75_v52 = vadd.f32 %v218_v43, %v74_v51 }
  0xa9   :  { %v78_v53 = vmax.f32 %v75_v52, 0.0 }
  0xab   :  { %118 = vmatmul.f32.gmra.mxu1 %v78_v53 }
 0x120   :  { %v116_v5 = vpop.f32.mrf.mxu1 }
 0x121   :  { %v117_v6 = vadd.f32 %v219_v2, %v116_v5 }
 0x123   :  { %v122_v8 = vmax.f32 %v117_v6, 0.0 }
 0x125   :  { %160 = vmatmul.f32.vlgmr.msra.gmra.mxu2 %v122_v8 }
 0x128   :  { %v119_v10 = vpop.f32.mrf.mxu1 }
 0x129   :  { %v120_v11 = vadd.f32 %v219_v2, %v119_v10 }
 0x12b   :  { %v123_v12 = vmax.f32 %v120_v11, 0.0 }
 0x12d   :  { %163 = vmatmul.f32.gmra.mxu2 %v123_v12 }
 0x1a8   :  { %v161_v17 = vpop.f32.mrf.mxu2 }
 0x1a9   :  { %v162_v18 = vadd.f32 %v220_v16, %v161_v17 }
 0x1ab   :  { %v167_v19 = vmax.f32 %v162_v18, 0.0 }
 0x1ad   :  { %205 = vmatmul.f32.vlgmr.msra.gmra.mxu3 %v167_v19 }
 0x1b0   :  { %v164_v20 = vpop.f32.mrf.mxu2 }
 0x1b1   :  { %v165_v21 = vadd.f32 %v220_v16, %v164_v20 }
 0x1b3   :  { %v168_v22 = vmax.f32 %v165_v21, 0.0 }
 0x1b5   :  { %208 = vmatmul.f32.gmra.mxu3 %v168_v22 }
 0x230   :  { %v206_v24 = vpop.f32.mrf.mxu3 }
 0x231   :  { %v207_v25 = vadd.f32 %v221_v23, %v206_v24 }
 0x233   :  { %212 = vst [vmem:[%s497_s9] sm:$0xff] %v207_v25 }
 0x238   :  { %v209_v26 = vpop.f32.mrf.mxu3 }
 0x239   :  { %v210_v27 = vadd.f32 %v221_v23, %v209_v26 }
 0x23b   :  { %213 = vst [vmem:[%s497_s9 + $0x8] sm:$0xff] %v210_v27 }

</bundles_post_ra>
